<compile_context>
chip_gen: v6e
topology: v6e:2x2x1
jax: 0.10.0
libtpu: 0.0.40
codegen_flags: <defaults>
</compile_context>

<pallas_src>
import functools
import math

import jax
import jax.numpy as jnp
from jax.experimental import pallas as pl
from jax.experimental.pallas import tpu as pltpu

CLASSES = 7
LANE = 128
NEG_BIG = -1e30  # finite "-inf": exp() underflows to 0.0, no NaN propagation


def _round_up(n, m):
    return ((n + m - 1) // m) * m


def _vmem_capacity_bytes():
    """Physical VMEM of the local chip; v7x-safe (64 MiB) fallback."""
    try:
        return int(pltpu.get_tpu_info().vmem_capacity_bytes)
    except Exception:
        return 64 * 1024 * 1024


def _compute_dtype_for(x_dtype):
    dt = jnp.dtype(x_dtype)
    if dt in (jnp.dtype(jnp.bfloat16), jnp.dtype(jnp.float32)):
        return dt
    # TODO(synk): true int8-MXU path (v5e/v6e) needs quantized weights+scales;
    # until then stream narrow/int inputs as bf16 (half of an f32 fallback).
    return jnp.dtype(jnp.bfloat16)


def _select_tiles(batch, d_pad, in_isz, out_isz, cpad, sub, budget):
    """Largest (tb, tk) whose FULL resident set fits `budget` bytes of VMEM."""

    def resident(tb, tk):
        return (2 * tb * tk * in_isz          # x tiles (double buffered)
                + 2 * tk * cpad * in_isz      # W tiles
                + 2 * tb * cpad * out_isz     # logits tiles
                + 2 * tb * 4                  # per-sample loss tiles
                + 2 * tb * 4                  # label tiles
                + 2 * cpad * 4                # bias
                + tb * cpad * 4)              # f32 accumulator scratch

    # Batch tile: big enough to amortize the ~0.35us/step overhead (cap 2048),
    # but leave >=2 grid steps so v7x's two TensorCores both get work.
    tb_cap = min(2048, _round_up(batch, sub))
    if batch > sub:
        tb_cap = max(sub, min(tb_cap, _round_up(pl.cdiv(batch, 2), sub)))

    def shrink(tb):
        return max(sub, ((tb // 2) // sub) * sub)

    # Phase 1: full-K (W is DMA'd exactly once per forward) at the largest tb.
    tb = tb_cap
    while True:
        if resident(tb, d_pad) <= budget:
            return tb, d_pad
        if tb == sub:
            break
        tb = shrink(tb)

    # Phase 2: K-tiled.  Maximize tb first (it sets how often W re-streams),
    # then take the largest lane-aligned tk that divides the padded K extent.
    tk_cands = [tk for tk in range(d_pad - LANE, 0, -LANE) if d_pad % tk == 0]
    tb = tb_cap
    while True:
        for tk in tk_cands:
            if resident(tb, tk) <= budget:
                return tb, tk
        if tb == sub:
            break
        tb = shrink(tb)
    return sub, LANE


# ---------------------------------------------------------------------------
# Kernel
# ---------------------------------------------------------------------------
def _action_head_kernel(*refs, classes, d, tk, smoothing, use_smoothing,
                        have_label, mask_k):
    """One (batch-tile, K-tile) grid step.

    Accumulates x_tile @ W_tile into an f32 VMEM scratch along the trailing
    "arbitrary" K axis; at the last K step adds the bias, stores lane-dense
    logits and (optionally) the per-sample CE / label-smoothing loss."""
    if have_label:
        x_ref, w_ref, b_ref, label_ref, logits_ref, loss_ref, acc_ref = refs
    else:
        x_ref, w_ref, b_ref, logits_ref, acc_ref = refs

    k = pl.program_id(1)

    @pl.when(k == 0)
    def _init():
        acc_ref[...] = jnp.zeros_like(acc_ref)

    x = x_ref[...]
    if mask_k:
        # K is padded to a multiple of 128: zero the tail columns so the
        # zero-padded weight rows never meet uninitialized activations.
        col = jax.lax.broadcasted_iota(jnp.int32, x.shape, 1) + k * tk
        x = jnp.where(col < d, x, jnp.zeros_like(x))
    acc_ref[...] += jnp.dot(x, w_ref[...], preferred_element_type=jnp.float32)

    @pl.when(k == pl.num_programs(1) - 1)
    def _finalize():
        logits = acc_ref[...] + b_ref[...]                     # [tb, cpad] f32
        logits_ref[...] = logits.astype(logits_ref.dtype)
        if have_label:
            col_ids = jax.lax.broadcasted_iota(jnp.int32, logits.shape, 1)
            col_valid = col_ids < classes
            masked = jnp.where(col_valid, logits, jnp.float32(NEG_BIG))
            # numerically-stable log-softmax over the real classes only
            m = jnp.max(masked, axis=-1, keepdims=True)
            lse = m + jnp.log(jnp.sum(jnp.exp(masked - m), axis=-1,
                                      keepdims=True))
            logp = masked - lse
            # log-prob of the target via one-hot compare (no gather)
            onehot = (col_ids == label_ref[...]).astype(jnp.float32)
            picked = jnp.sum(onehot * logp, axis=-1, keepdims=True)
            if use_smoothing:
                off = jnp.sum(jnp.where(col_valid, logp, 0.0), axis=-1,
                              keepdims=True) - picked
                per_sample = -((1.0 - smoothing) * picked
                               + (smoothing / (classes - 1)) * off)
            else:
                per_sample = -picked
            loss_ref[...] = per_sample                         # [tb, 1] f32


# ---------------------------------------------------------------------------
# Params (hoisted, one-time prep)
# ---------------------------------------------------------------------------
def init_params(key, in_features, classes=CLASSES, dtype=jnp.float32):
    """Deterministic dense-classifier params (nn.Linear-style init)."""
    kw, kb = jax.random.split(key)
    bound = 1.0 / math.sqrt(in_features)
    w = jax.random.uniform(kw, (in_features, classes), dtype, -bound, bound)
    b = jax.random.uniform(kb, (classes,), dtype, -bound, bound)
    return w, b


def prepare_params(w, b, compute_dtype=jnp.float32):
    """One-time param prep: pad classes to 128 lanes, pad the feature dim to a
    multiple of 128 (zeros), and cast W to the activation/compute dtype.
    Cache the result; per-step forwards then touch no wrapper-side weight
    copies (the old per-call 18x padded-W HBM fill is gone)."""
    d, classes = w.shape
    cpad = _round_up(classes, LANE)
    d_pad = _round_up(d, LANE)
    compute_dtype = jnp.dtype(compute_dtype)
    w_p = jnp.zeros((d_pad, cpad), compute_dtype).at[:d, :classes].set(
        w.astype(compute_dtype))
    b_p = jnp.zeros((1, cpad), jnp.float32).at[:, :classes].set(
        b.reshape(1, classes).astype(jnp.float32))
    return w_p, b_p, classes


# ---------------------------------------------------------------------------
# Wrapper (ActionBasicModule.forward)
# ---------------------------------------------------------------------------
def action_basic_forward(x, params, label=None, loss_mode='smoothin',
                         smoothing=0.0):
    """Mirror of ActionBasicModule.forward.

    x: [B, ...] activations; params from prepare_params(); label optional [B].
    Returns logits [B, classes], or (logits, loss) when label is given."""
    w_p, b_p, classes = params
    batch = x.shape[0]
    d = math.prod(x.shape[1:])
    d_pad, cpad = w_p.shape
    if d_pad != _round_up(d, LANE):
        raise ValueError("params were prepared for a different feature size")

    compute_dtype = _compute_dtype_for(x.dtype)
    if jnp.dtype(w_p.dtype) != compute_dtype:
        # TODO(synk): prepare params in the activation dtype up front to avoid
        # this per-call weight cast.
        w_p = w_p.astype(compute_dtype)

    x_flat = x.reshape(batch, d)
    if jnp.dtype(x_flat.dtype) != compute_dtype:
        x_flat = x_flat.astype(compute_dtype)

    in_isz = compute_dtype.itemsize
    # bf16 activations -> bf16 lane-dense logits store (halves the 128-wide
    # writeback); loss math stays f32 inside the kernel.
    logits_dtype = (compute_dtype if compute_dtype == jnp.dtype(jnp.bfloat16)
                    else jnp.dtype(jnp.float32))
    out_isz = logits_dtype.itemsize
    sub = 16 if compute_dtype == jnp.dtype(jnp.bfloat16) else 8

    vmem_cap = _vmem_capacity_bytes()
    vmem_limit = int(min(vmem_cap * 3 // 4, 100 * 1024 * 1024))  # 48M v7x, 96M v5e/v6e
    budget = vmem_limit - 2 * 1024 * 1024
    tb, tk = _select_tiles(batch, d_pad, in_isz, out_isz, cpad, sub, budget)
    nb = pl.cdiv(batch, tb)
    nk = d_pad // tk

    x_spec = pl.BlockSpec((tb, tk), lambda i, k: (i, k))
    w_spec = pl.BlockSpec((tk, cpad), lambda i, k: (k, 0))
    b_spec = pl.BlockSpec((1, cpad), lambda i, k: (0, 0))
    logits_spec = pl.BlockSpec((tb, cpad), lambda i, k: (i, 0))

    compiler_params = pltpu.CompilerParams(
        dimension_semantics=("parallel", "arbitrary"),
        vmem_limit_bytes=vmem_limit,
    )
    cost = pl.CostEstimate(
        flops=2 * nb * tb * d_pad * cpad,
        transcendentals=(nb * tb * cpad) if label is not None else 0,
        bytes_accessed=int(batch * d * in_isz
                           + (1 if nk == 1 else nb) * d_pad * cpad * in_isz
                           + batch * cpad * out_isz
                           + (batch * 8 if label is not None else 0)),
    )
    scratch = [pltpu.VMEM((tb, cpad), jnp.float32)]
    common = dict(classes=classes, d=d, tk=tk, smoothing=float(smoothing),
                  use_smoothing=(loss_mode == 'smoothing'),
                  mask_k=(d_pad != d))

    if label is None:
        kernel = functools.partial(_action_head_kernel, have_label=False,
                                   **common)
        logits_pad = pl.pallas_call(
            kernel,
            out_shape=jax.ShapeDtypeStruct((batch, cpad), logits_dtype),
            grid_spec=pltpu.PrefetchScalarGridSpec(
                num_scalar_prefetch=0,
                grid=(nb, nk),
                in_specs=[x_spec, w_spec, b_spec],
                out_specs=logits_spec,
                scratch_shapes=scratch),
            compiler_params=compiler_params,
            cost_estimate=cost,
        )(x_flat, w_p, b_p)
        return logits_pad[:, :classes]

    label_col = label.reshape(batch, 1).astype(jnp.int32)
    label_spec = pl.BlockSpec((tb, 1), lambda i, k: (i, 0))
    loss_spec = pl.BlockSpec((tb, 1), lambda i, k: (i, 0))

    kernel = functools.partial(_action_head_kernel, have_label=True, **common)
    logits_pad, per_sample = pl.pallas_call(
        kernel,
        out_shape=(jax.ShapeDtypeStruct((batch, cpad), logits_dtype),
                   jax.ShapeDtypeStruct((batch, 1), jnp.float32)),
        grid_spec=pltpu.PrefetchScalarGridSpec(
            num_scalar_prefetch=0,
            grid=(nb, nk),
            in_specs=[x_spec, w_spec, b_spec, label_spec],
            out_specs=(logits_spec, loss_spec),
            scratch_shapes=scratch),
        compiler_params=compiler_params,
        cost_estimate=cost,
    )(x_flat, w_p, b_p, label_col)

    logits = logits_pad[:, :classes]
    # Global mean over the true batch; ragged-tile rows never reach HBM
    # (out_shape is exactly [batch, ...]; OOB block rows are masked stores).
    loss = jnp.sum(per_sample[:, 0]) / batch
    return logits, loss


# ---------------------------------------------------------------------------
# Pure-JAX references (silent sanity checks)
# ---------------------------------------------------------------------------
def _reference_ce(x, w, b, label):
    bsz = x.shape[0]
    logits = (x.reshape(bsz, -1).astype(jnp.float32) @ w.astype(jnp.float32)
              + b.astype(jnp.float32))
    logp = jax.nn.log_softmax(logits, axis=-1)
    nll = -jnp.take_along_axis(logp, label.reshape(bsz, 1).astype(jnp.int32),
                               axis=-1)
    return logits, jnp.mean(nll)


def _reference_smooth(x, w, b, label, classes, smoothing):
    bsz = x.shape[0]
    logits = (x.reshape(bsz, -1).astype(jnp.float32) @ w.astype(jnp.float32)
              + b.astype(jnp.float32))
    logp = jax.nn.log_softmax(logits, axis=-1)
    onehot = jax.nn.one_hot(label, classes, dtype=jnp.float32)
    true_dist = (onehot * (1.0 - smoothing)
                 + (1.0 - onehot) * (smoothing / (classes - 1)))
    return logits, jnp.mean(jnp.sum(-true_dist * logp, axis=-1))


if __name__ == "__main__":
    key = jax.random.PRNGKey(0)
    kx, kl, kp, kx2, kl2, kp2 = jax.random.split(key, 6)

    # --- main path: B=2, C=4, 16x16 (d = 1024, lane-aligned) -----------------
    B, C, H, W = 2, 4, 16, 16
    x = jax.random.normal(kx, (B, C, H, W), dtype=jnp.float32)
    label = jax.random.randint(kl, (B,), 0, CLASSES, dtype=jnp.int32)
    w, b = init_params(kp, in_features=C * H * W, classes=CLASSES)
    params = prepare_params(w, b)                  # hoisted one-time padding

    logits, loss = action_basic_forward(x, params, label=label)      # CE path
    logits_s, loss_s = action_basic_forward(x, params, label=label,
                                            loss_mode='smoothing',
                                            smoothing=0.1)
    logits_only = action_basic_forward(x, params)                    # inference
    jax.block_until_ready((logits, loss, logits_s, loss_s, logits_only))

    ref_logits, ref_loss = _reference_ce(x, w, b, label)
    _, ref_loss_s = _reference_smooth(x, w, b, label, CLASSES, 0.1)
    assert logits.shape == (B, CLASSES)
    assert jnp.allclose(logits, ref_logits, atol=1e-4, rtol=1e-4)
    assert jnp.allclose(loss, ref_loss, atol=1e-4, rtol=1e-4)
    assert jnp.allclose(loss_s, ref_loss_s, atol=1e-4, rtol=1e-4)
    assert jnp.allclose(logits_only, ref_logits, atol=1e-4, rtol=1e-4)

    # --- ragged batch + non-128 feature dim: exercises partial blocks and the
    #     in-kernel K-tail mask (no wrapper-side padding of x anywhere) -------
    B2, C2, H2, W2 = 10, 3, 10, 10                 # d = 300
    x2 = jax.random.normal(kx2, (B2, C2, H2, W2), dtype=jnp.float32)
    label2 = jax.random.randint(kl2, (B2,), 0, CLASSES, dtype=jnp.int32)
    w2, b2 = init_params(kp2, in_features=C2 * H2 * W2, classes=CLASSES)
    params2 = prepare_params(w2, b2)
    logits2, loss2 = action_basic_forward(x2, params2, label=label2)
    jax.block_until_ready((logits2, loss2))
    ref_logits2, ref_loss2 = _reference_ce(x2, w2, b2, label2)
    assert jnp.allclose(logits2, ref_logits2, atol=1e-4, rtol=1e-4)
    assert jnp.allclose(loss2, ref_loss2, atol=1e-4, rtol=1e-4)

    # --- bf16 activation streaming (bf16 MXU + bf16 lane-dense logits store) -
    params_bf16 = prepare_params(w, b, compute_dtype=jnp.bfloat16)
    logits_bf, loss_bf = action_basic_forward(x.astype(jnp.bfloat16),
                                              params_bf16, label=label)
    jax.block_until_ready((logits_bf, loss_bf))
    assert logits_bf.dtype == jnp.bfloat16
    assert bool(jnp.isfinite(loss_bf))
    assert abs(float(loss_bf) - float(ref_loss)) < 0.1   # bf16 drift tolerance

    print("KERNEL_OK")
</pallas_src>

<mosaic_0001>
module attributes {stable_mosaic.version = 11 : i64} {
  func.func @_action_head_kernel(%arg0: i32, %arg1: i32, %arg2: memref<8x1024xf32, #tpu.memory_space<vmem>>, %arg3: memref<1024x128xf32, #tpu.memory_space<vmem>>, %arg4: memref<1x128xf32, #tpu.memory_space<vmem>>, %arg5: memref<8x1xi32, #tpu.memory_space<vmem>>, %arg6: memref<8x128xf32, #tpu.memory_space<vmem>>, %arg7: memref<8x1xf32, #tpu.memory_space<vmem>>, %arg8: memref<8x128xf32, #tpu.memory_space<vmem>>) attributes {dimension_semantics = [#tpu.dimension_semantics<parallel>, #tpu.dimension_semantics<arbitrary>], iteration_bounds = array<i64: 1, 1>, scalar_prefetch = 0 : i64, scratch_operands = 1 : i64, tpu.core_type = #tpu.core_type<tc>, window_params = [{transform_indices = @transform_0, window_bounds = array<i64: 8, 1024>}, {transform_indices = @transform_1, window_bounds = array<i64: 1024, 128>}, {pipeline_mode = #tpu.pipeline_mode<synchronous>, transform_indices = @transform_2, window_bounds = array<i64: 1, 128>}, {transform_indices = @transform_3, window_bounds = array<i64: 8, 1>}, {transform_indices = @transform_4, window_bounds = array<i64: 8, 128>}, {transform_indices = @transform_5, window_bounds = array<i64: 8, 1>}]} {
    %c0_i32 = arith.constant 0 : i32
    %0 = arith.cmpi eq, %arg1, %c0_i32 : i32
    %1 = arith.extui %0 : i1 to i32
    %c0_i32_0 = arith.constant 0 : i32
    %2 = arith.cmpi ne, %1, %c0_i32_0 : i32
    scf.if %2 {
      %cst_10 = arith.constant 0.000000e+00 : f32
      %12 = vector.broadcast %cst_10 : f32 to vector<8x128xf32>
      %c0_11 = arith.constant 0 : index
      %c0_12 = arith.constant 0 : index
      %13 = vector.load %arg8[%c0_11, %c0_12] : memref<8x128xf32, #tpu.memory_space<vmem>>, vector<8x128xf32>
      tpu.vector_store %arg8[%c0_11, %c0_12], %12 {strides = array<i32>} : memref<8x128xf32, #tpu.memory_space<vmem>>, vector<8x128xf32>,
    } else {
    }
    %c0 = arith.constant 0 : index
    %c0_1 = arith.constant 0 : index
    %3 = vector.load %arg2[%c0, %c0_1] : memref<8x1024xf32, #tpu.memory_space<vmem>>, vector<8x1024xf32>
    %c0_2 = arith.constant 0 : index
    %c0_3 = arith.constant 0 : index
    %4 = vector.load %arg8[%c0_2, %c0_3] : memref<8x128xf32, #tpu.memory_space<vmem>>, vector<8x128xf32>
    %c0_4 = arith.constant 0 : index
    %c0_5 = arith.constant 0 : index
    %5 = vector.load %arg3[%c0_4, %c0_5] : memref<1024x128xf32, #tpu.memory_space<vmem>>, vector<1024x128xf32>
    %cst = arith.constant dense<0.000000e+00> : vector<8x128xf32>
    %6 = tpu.matmul %3, %5, %cst {dimension_numbers = #tpu.dot_dimension_numbers<[1], [0], [0], [1], [0, 0, 1, 1], [], []>} : vector<8x1024xf32>, vector<1024x128xf32>, vector<8x128xf32> -> vector<8x128xf32>
    %7 = arith.addf %4, %6 : vector<8x128xf32>
    %c0_6 = arith.constant 0 : index
    %c0_7 = arith.constant 0 : index
    %8 = vector.load %arg8[%c0_6, %c0_7] : memref<8x128xf32, #tpu.memory_space<vmem>>, vector<8x128xf32>
    tpu.vector_store %arg8[%c0_6, %c0_7], %7 {strides = array<i32>} : memref<8x128xf32, #tpu.memory_space<vmem>>, vector<8x128xf32>,
    %c0_i32_8 = arith.constant 0 : i32
    %9 = arith.cmpi eq, %arg1, %c0_i32_8 : i32
    %10 = arith.extui %9 : i1 to i32
    %c0_i32_9 = arith.constant 0 : i32
    %11 = arith.cmpi ne, %10, %c0_i32_9 : i32
    scf.if %11 {
      %c0_10 = arith.constant 0 : index
      %c0_11 = arith.constant 0 : index
      %12 = vector.load %arg8[%c0_10, %c0_11] : memref<8x128xf32, #tpu.memory_space<vmem>>, vector<8x128xf32>
      %c0_12 = arith.constant 0 : index
      %c0_13 = arith.constant 0 : index
      %13 = vector.load %arg4[%c0_12, %c0_13] : memref<1x128xf32, #tpu.memory_space<vmem>>, vector<1x128xf32>
      %14 = vector.broadcast %13 : vector<1x128xf32> to vector<8x128xf32>
      %15 = arith.addf %12, %14 : vector<8x128xf32>
      %c0_14 = arith.constant 0 : index
      %c0_15 = arith.constant 0 : index
      %16 = vector.load %arg6[%c0_14, %c0_15] : memref<8x128xf32, #tpu.memory_space<vmem>>, vector<8x128xf32>
      tpu.vector_store %arg6[%c0_14, %c0_15], %15 {strides = array<i32>} : memref<8x128xf32, #tpu.memory_space<vmem>>, vector<8x128xf32>,
      %17 = tpu.iota {dimensions = array<i32: 1>} : vector<8x128xi32>
      %c7_i32 = arith.constant 7 : i32
      %18 = vector.broadcast %c7_i32 : i32 to vector<8x128xi32>
      %19 = arith.cmpi slt, %17, %18 : vector<8x128xi32>
      %cst_16 = arith.constant -1.000000e+30 : f32
      %20 = vector.broadcast %cst_16 : f32 to vector<8x128xf32>
      %21 = arith.select %19, %15, %20 : vector<8x128xi1>, vector<8x128xf32>
      %cst_17 = arith.constant dense<0xFF800000> : vector<8xf32>
      %22 = vector.multi_reduction <maximumf>, %21, %cst_17 [1] : vector<8x128xf32> to vector<8xf32>
      %23 = vector.shape_cast %22 : vector<8xf32> to vector<8x1xf32>
      %24 = vector.broadcast %23 : vector<8x1xf32> to vector<8x128xf32>
      %25 = arith.subf %21, %24 : vector<8x128xf32>
      %26 = math.exp %25 : vector<8x128xf32>
      %cst_18 = arith.constant dense<0.000000e+00> : vector<8xf32>
      %27 = vector.multi_reduction <add>, %26, %cst_18 [1] : vector<8x128xf32> to vector<8xf32>
      %28 = vector.shape_cast %27 : vector<8xf32> to vector<8x1xf32>
      %29 = math.log %28 : vector<8x1xf32>
      %30 = arith.addf %23, %29 : vector<8x1xf32>
      %31 = vector.broadcast %30 : vector<8x1xf32> to vector<8x128xf32>
      %32 = arith.subf %21, %31 : vector<8x128xf32>
      %c0_19 = arith.constant 0 : index
      %c0_20 = arith.constant 0 : index
      %33 = vector.load %arg5[%c0_19, %c0_20] : memref<8x1xi32, #tpu.memory_space<vmem>>, vector<8x1xi32>
      %34 = vector.broadcast %33 : vector<8x1xi32> to vector<8x128xi32>
      %35 = arith.cmpi eq, %17, %34 : vector<8x128xi32>
      %36 = arith.extui %35 : vector<8x128xi1> to vector<8x128xi32>
      %37 = arith.sitofp %36 : vector<8x128xi32> to vector<8x128xf32>
      %38 = arith.mulf %37, %32 : vector<8x128xf32>
      %cst_21 = arith.constant dense<0.000000e+00> : vector<8xf32>
      %39 = vector.multi_reduction <add>, %38, %cst_21 [1] : vector<8x128xf32> to vector<8xf32>
      %40 = vector.shape_cast %39 : vector<8xf32> to vector<8x1xf32>
      %cst_22 = arith.constant 0.000000e+00 : f32
      %41 = vector.broadcast %cst_22 : f32 to vector<8x1xf32>
      %42 = arith.subf %41, %40 : vector<8x1xf32>
      %c0_23 = arith.constant 0 : index
      %c0_24 = arith.constant 0 : index
      %43 = vector.load %arg7[%c0_23, %c0_24] : memref<8x1xf32, #tpu.memory_space<vmem>>, vector<8x1xf32>
      tpu.vector_store %arg7[%c0_23, %c0_24], %42 {strides = array<i32>} : memref<8x1xf32, #tpu.memory_space<vmem>>, vector<8x1xf32>,
    } else {
    }
    return
  }
  func.func @transform_0(%arg0: i32, %arg1: i32) -> (i32, i32) {
    %c0_i32 = arith.constant 0 : i32
    return %arg0, %arg1 : i32, i32
  }
  func.func @transform_1(%arg0: i32, %arg1: i32) -> (i32, i32) {
    %c0_i32 = arith.constant 0 : i32
    %c0_i32_0 = arith.constant 0 : i32
    return %arg1, %c0_i32 : i32, i32
  }
  func.func @transform_2(%arg0: i32, %arg1: i32) -> (i32, i32) {
    %c0_i32 = arith.constant 0 : i32
    %c0_i32_0 = arith.constant 0 : i32
    %c0_i32_1 = arith.constant 0 : i32
    return %c0_i32, %c0_i32_0 : i32, i32
  }
  func.func @transform_3(%arg0: i32, %arg1: i32) -> (i32, i32) {
    %c0_i32 = arith.constant 0 : i32
    %c0_i32_0 = arith.constant 0 : i32
    return %arg0, %c0_i32 : i32, i32
  }
  func.func @transform_4(%arg0: i32, %arg1: i32) -> (i32, i32) {
    %c0_i32 = arith.constant 0 : i32
    %c0_i32_0 = arith.constant 0 : i32
    return %arg0, %c0_i32 : i32, i32
  }
  func.func @transform_5(%arg0: i32, %arg1: i32) -> (i32, i32) {
    %c0_i32 = arith.constant 0 : i32
    %c0_i32_0 = arith.constant 0 : i32
    return %arg0, %c0_i32 : i32, i32
  }
}

</mosaic_0001>

<bundles_post_ra>
// kernel: tpu_custom_call.1
= control target key start
LH: loop header
LB: loop body
LE: loop exit
PB: predicated region body
PF: predicated region fallthrough
CT: control target
= control target key end

     0   :  { %11 = vsyncpa [#allocation4], 0  ;;  %s970_s0 = inlined_call_operand.hbm [shape: f32[2,1024], index: 0, kind: input, shape index: {}]   ;;  %s971_s1 = inlined_call_operand.hbm [shape: f32[1024,128], index: 1, kind: input, shape index: {}]   ;;  %s972_s2 = inlined_call_operand.vmem [shape: f32[1,128], index: 2, kind: input, shape index: {}]   ;;  %s973_s3 = inlined_call_operand.vmem [shape: s32[2,1], index: 3, kind: input, shape index: {}]   ;;  %s974_s4 = inlined_call_operand.hbm [shape: f32[2,128], index: 4, kind: output, shape index: {0}]   ;;  %s975_s5 = inlined_call_operand.vmem [shape: f32[2,1], index: 5, kind: output, shape index: {1}]  }
   0x1   :  { %12 = vsyncpa [#allocation7], 0 }
   0x2   :  { %13 = vsyncpa [#allocation5], 0 }
   0x3   :  { %18 = vsyncadd [#allocation4], 768  ;;  %s898_s18 = smov [#allocation3]  }
   0x4   :  { %s19_s19 = sshll.u32 %s898_s18, 4  ;;  %s20_s19 = int_to_ptr.vmem [resolvable:$true] %s19_s19 }
   0x5   :  { %s840_s20 = scalar_lea.vmem %s20_s19, 256  ;;  %s844_s21 = scalar_lea.vmem %s20_s19, 1024 }
   0x6   :  { %p841_p0 = scmp.ne.s32.totalorder %s20_s19, %s840_s20  ;;  %p845_p1 = scmp.lt.s32.totalorder %s20_s19, %s20_s19 }
   0x7   :  { %p846_p2 = scmp.lt.s32.totalorder %s844_s21, %s840_s20 }
   0x9   :  { %p847_p3 = por %p846_p2, %p845_p1 }
   0xb   :  { %p848_p4 = pnand %p847_p3, %p841_p0 }
   0xd   :  { %851 = shalt.err (!%p848_p4)
}
   0xe   :  { %s899_s22 = smov 256   ;;  %s900_s23 = smov 16  }
   0xf   :  { %25 = dma.hbm_to_vmem [thread:$0]  %s970_s0, 256, %s20_s19, [#allocation4], %s899_s22, %s899_s22, %s900_s23  }
  0x10   :  { %s901_s26 = smov [#allocation6]  }
  0x11   :  { %s31_s27 = sshll.u32 %s901_s26, 4  ;;  %s32_s27 = int_to_ptr.vmem [resolvable:$true] %s31_s27 }
  0x12   :  { %s860_s28 = scalar_lea.vmem %s32_s27, 16384  ;;  %p865_p6 = scmp.lt.s32.totalorder %s32_s27, %s32_s27 }
  0x13   :  { %p861_p5 = scmp.ne.s32.totalorder %s32_s27, %s860_s28  ;;  %p866_p7 = scmp.lt.s32.totalorder %s860_s28, %s860_s28 }
  0x15   :  { %p867_p8 = por %p866_p7, %p865_p6 }
  0x17   :  { %p868_p9 = pnand %p867_p8, %p861_p5 }
  0x19   :  { %871 = shalt.err (!%p868_p9)
}
  0x1a   :  { %s902_s29 = smov 128   ;;  %s903_s30 = smov 8  }
  0x1b   :  { %37 = dma.hbm_to_vmem [thread:$0]  %s971_s1, 16384, %s32_s27, [#allocation7], %s902_s29, %s902_s29, %s903_s30  }
  0x1c   :  { %892 = dma.done.wait [#allocation4], 1024  }
  0x1d   :  { %893 = vsyncadd [#allocation4], 4294966272 }
  0x1e   :  { %894 = dma.done.wait [#allocation7], 16384  }
  0x1f   :  { %895 = vsyncadd [#allocation7], 4294950912  ;;  %v93_v0 = vld [vmem:[#allocation6 + $0xf8] sm:$0xff]  ;;  %v92_v4 = vld [vmem:[#allocation6 + $0xf0] sm:$0xff]  ;;  %v904_v30 = vmov 1983009808   ;;  %v205_v32 = vlaneseq }
  0x20   :  { %v125_v1 = vld [vmem:[#allocation6 + $0x1f8] sm:$0xff]  ;;  %662 = vmatprep.subr.mxu0 %v93_v0  ;;  %v124_v5 = vld [vmem:[#allocation6 + $0x1f0] sm:$0xff]  ;;  %v91_v8 = vld [vmem:[#allocation6 + $0xe8] sm:$0xff]  ;;  %v203_v31 = vunpack.c.l.s4 %v904_v30  ;;  %vm599_vm2 = vcmask 7168  }
  0x21   :  { %v77_v2 = vld [vmem:[#allocation6 + $0x78] sm:$0xff]  ;;  %697 = vmatprep.subr.mxu1 %v125_v1  ;;  %v76_v6 = vld [vmem:[#allocation6 + $0x70] sm:$0xff]  ;;  %v123_v9 = vld [vmem:[#allocation6 + $0x1e8] sm:$0xff]  ;;  %v206_v42 = vshrl.u32 %v205_v32, 7 }
  0x22   :  { %v109_v3 = vld [vmem:[#allocation6 + $0x178] sm:$0xff]  ;;  %663 = vmatpush3.msra.mxu0 %v77_v2  ;;  %v108_v7 = vld [vmem:[#allocation6 + $0x170] sm:$0xff]  ;;  %v75_v10 = vld [vmem:[#allocation6 + $0x68] sm:$0xff]  ;;  %v204_v41 = vunpack.c.0.s8 %v203_v31 }
  0x23   :  { %698 = vmatpush3.msra.mxu1 %v109_v3  ;;  %664 = vmatprep.subr.mxu0 %v92_v4  ;;  %v107_v11 = vld [vmem:[#allocation6 + $0x168] sm:$0xff]  ;;  %v90_v12 = vld [vmem:[#allocation6 + $0xe0] sm:$0xff]  ;;  %v89_v16 = vld [vmem:[#allocation6 + $0xd8] sm:$0xff] }
  0x24   :  { %699 = vmatprep.subr.mxu1 %v124_v5  ;;  %665 = vmatpush3.msra.mxu0 %v76_v6  ;;  %v122_v13 = vld [vmem:[#allocation6 + $0x1e0] sm:$0xff]  ;;  %v121_v17 = vld [vmem:[#allocation6 + $0x1d8] sm:$0xff]  ;;  %v88_v20 = vld [vmem:[#allocation6 + $0xd0] sm:$0xff]  ;;  %v947_v55 = vsub.s32 %v204_v41, %v206_v42 }
  0x25   :  { %700 = vmatpush3.msra.mxu1 %v108_v7  ;;  %666 = vmatprep.subr.mxu0 %v91_v8  ;;  %v74_v14 = vld [vmem:[#allocation6 + $0x60] sm:$0xff]  ;;  %v73_v18 = vld [vmem:[#allocation6 + $0x58] sm:$0xff]  ;;  %v120_v21 = vld [vmem:[#allocation6 + $0x1d0] sm:$0xff] }
  0x26   :  { %701 = vmatprep.subr.mxu1 %v123_v9  ;;  %v106_v15 = vld [vmem:[#allocation6 + $0x160] sm:$0xff]  ;;  %667 = vmatpush3.msra.mxu0 %v75_v10  ;;  %v105_v19 = vld [vmem:[#allocation6 + $0x158] sm:$0xff]  ;;  %v72_v22 = vld [vmem:[#allocation6 + $0x50] sm:$0xff] }
  0x27   :  { %702 = vmatpush3.msra.mxu1 %v107_v11  ;;  %668 = vmatprep.subr.mxu0 %v90_v12  ;;  %v104_v23 = vld [vmem:[#allocation6 + $0x150] sm:$0xff]  ;;  %v87_v24 = vld [vmem:[#allocation6 + $0xc8] sm:$0xff]  ;;  %v86_v28 = vld [vmem:[#allocation6 + $0xc0] sm:$0xff] }
  0x28   :  { %703 = vmatprep.subr.mxu1 %v122_v13  ;;  %669 = vmatpush3.msra.mxu0 %v74_v14  ;;  %v119_v25 = vld [vmem:[#allocation6 + $0x1c8] sm:$0xff]  ;;  %v118_v29 = vld [vmem:[#allocation6 + $0x1c0] sm:$0xff]  ;;  %v85_v35 = vld [vmem:[#allocation6 + $0xb8] sm:$0xff] }
  0x29   :  { %704 = vmatpush3.msra.mxu1 %v106_v15  ;;  %670 = vmatprep.subr.mxu0 %v89_v16  ;;  %v71_v26 = vld [vmem:[#allocation6 + $0x48] sm:$0xff]  ;;  %v70_v33 = vld [vmem:[#allocation6 + $0x40] sm:$0xff]  ;;  %v117_v36 = vld [vmem:[#allocation6 + $0x1b8] sm:$0xff] }
  0x2a   :  { %705 = vmatprep.subr.mxu1 %v121_v17  ;;  %671 = vmatpush3.msra.mxu0 %v73_v18  ;;  %v103_v27 = vld [vmem:[#allocation6 + $0x148] sm:$0xff]  ;;  %v102_v34 = vld [vmem:[#allocation6 + $0x140] sm:$0xff]  ;;  %v69_v37 = vld [vmem:[#allocation6 + $0x38] sm:$0xff] }
  0x2b   :  { %706 = vmatpush3.msra.mxu1 %v105_v19  ;;  %672 = vmatprep.subr.mxu0 %v88_v20  ;;  %v101_v38 = vld [vmem:[#allocation6 + $0x138] sm:$0xff]  ;;  %v84_v39 = vld [vmem:[#allocation6 + $0xb0] sm:$0xff]  ;;  %v83_v45 = vld [vmem:[#allocation6 + $0xa8] sm:$0xff] }
  0x2c   :  { %707 = vmatprep.subr.mxu1 %v120_v21  ;;  %673 = vmatpush3.msra.mxu0 %v72_v22  ;;  %v116_v40 = vld [vmem:[#allocation6 + $0x1b0] sm:$0xff]  ;;  %v115_v46 = vld [vmem:[#allocation6 + $0x1a8] sm:$0xff]  ;;  %v82_v49 = vld [vmem:[#allocation6 + $0xa0] sm:$0xff] }
  0x2d   :  { %708 = vmatpush3.msra.mxu1 %v104_v23  ;;  %674 = vmatprep.subr.mxu0 %v87_v24  ;;  %v68_v43 = vld [vmem:[#allocation6 + $0x30] sm:$0xff]  ;;  %v67_v47 = vld [vmem:[#allocation6 + $0x28] sm:$0xff]  ;;  %v114_v50 = vld [vmem:[#allocation6 + $0x1a0] sm:$0xff] }
  0x2e   :  { %709 = vmatprep.subr.mxu1 %v119_v25  ;;  %675 = vmatpush3.msra.mxu0 %v71_v26  ;;  %v100_v44 = vld [vmem:[#allocation6 + $0x130] sm:$0xff]  ;;  %v99_v48 = vld [vmem:[#allocation6 + $0x128] sm:$0xff]  ;;  %v66_v51 = vld [vmem:[#allocation6 + $0x20] sm:$0xff] }
  0x2f   :  { %710 = vmatpush3.msra.mxu1 %v103_v27  ;;  %676 = vmatprep.subr.mxu0 %v86_v28  ;;  %v98_v52 = vld [vmem:[#allocation6 + $0x120] sm:$0xff]  ;;  %v81_v53 = vld [vmem:[#allocation6 + $0x98] sm:$0xff]  ;;  %v80_v62 = vld [vmem:[#allocation6 + $0x90] sm:$0xff] }
  0x30   :  { %711 = vmatprep.subr.mxu1 %v118_v29  ;;  %677 = vmatpush3.msra.mxu0 %v70_v33  ;;  %v113_v54 = vld [vmem:[#allocation6 + $0x198] sm:$0xff]  ;;  %v816_v57 = vld [vmem:[#allocation3] ss:$16 sps:$4 sm:$0xff]   ;;  %v820_v60 = vld [vmem:[#allocation3 + $0x4] ss:$16 sps:$4 sm:$0xff]  }
  0x31   :  { %712 = vmatpush3.msra.mxu1 %v102_v34  ;;  %678 = vmatprep.subr.mxu0 %v85_v35  ;;  %v65_v56 = vld [vmem:[#allocation6 + $0x18] sm:$0xff]  ;;  %v818_v58 = vld [vmem:[#allocation3 + $0x20] ss:$16 sps:$4 sm:$0xff]   ;;  %v821_v61 = vld [vmem:[#allocation3 + $0x24] ss:$16 sps:$4 sm:$0xff]   ;;  %v208_v0 = vrot.slane %v816_v57, %v947_v55  ;;  %v215_v4 = vrot.slane %v820_v60, %v947_v55 }
  0x32   :  { %713 = vmatprep.subr.mxu1 %v117_v36  ;;  %679 = vmatpush3.msra.mxu0 %v69_v37  ;;  %v97_v59 = vld [vmem:[#allocation6 + $0x118] sm:$0xff]  ;;  %v112_v63 = vld [vmem:[#allocation6 + $0x190] sm:$0xff]  ;;  %v222_v1 = vrot.slane %v818_v58, %v947_v55  ;;  %v229_v5 = vrot.slane %v821_v61, %v947_v55  ;;  %v79_v6 = vld [vmem:[#allocation6 + $0x88] sm:$0xff] }
  0x33   :  { %714 = vmatpush3.msra.mxu1 %v101_v38  ;;  %680 = vmatprep.subr.mxu0 %v84_v39  ;;  %v64_v2 = vld [vmem:[#allocation6 + $0x10] sm:$0xff]  ;;  %v111_v7 = vld [vmem:[#allocation6 + $0x188] sm:$0xff]  ;;  %v78_v10 = vld [vmem:[#allocation6 + $0x80] sm:$0xff] }
  0x34   :  { %715 = vmatprep.subr.mxu1 %v116_v40  ;;  %681 = vmatpush3.msra.mxu0 %v68_v43  ;;  %v96_v3 = vld [vmem:[#allocation6 + $0x110] sm:$0xff]  ;;  %v63_v8 = vld [vmem:[#allocation6 + $0x8] sm:$0xff]  ;;  %v110_v11 = vld [vmem:[#allocation6 + $0x180] sm:$0xff]  ;;  %v231_v12 = vcombine.high %v208_v0, %v222_v1  ;;  %v233_v14 = vcombine.high %v215_v4, %v229_v5  ;;  %v230_v16 = vcombine.low %v208_v0, %v222_v1 }
  0x35   :  { %716 = vmatpush3.msra.mxu1 %v100_v44  ;;  %682 = vmatprep.subr.mxu0 %v83_v45  ;;  %v95_v9 = vld [vmem:[#allocation6 + $0x108] sm:$0xff]  ;;  %v62_v13 = vld [vmem:[#allocation6] sm:$0xff]  ;;  %v232_v17 = vcombine.low %v215_v4, %v229_v5  ;;  %v157_v18 = vld [vmem:[#allocation6 + $0x2f8] sm:$0xff] }
  0x36   :  { %717 = vmatprep.subr.mxu1 %v115_v46  ;;  %683 = vmatpush3.msra.mxu0 %v67_v47  ;;  %v94_v15 = vld [vmem:[#allocation6 + $0x100] sm:$0xff]  ;;  %v189_v19 = vld [vmem:[#allocation6 + $0x3f8] sm:$0xff]  ;;  %v156_v22 = vld [vmem:[#allocation6 + $0x2f0] sm:$0xff] }
  0x37   :  { %718 = vmatpush3.msra.mxu1 %v99_v48  ;;  %684 = vmatprep.subr.mxu0 %v82_v49  ;;  %v141_v20 = vld [vmem:[#allocation6 + $0x278] sm:$0xff]  ;;  %v188_v23 = vld [vmem:[#allocation6 + $0x3f0] sm:$0xff]  ;;  %v155_v26 = vld [vmem:[#allocation6 + $0x2e8] sm:$0xff] }
  0x38   :  { %719 = vmatprep.subr.mxu1 %v114_v50  ;;  %685 = vmatpush3.msra.mxu0 %v66_v51  ;;  %v173_v21 = vld [vmem:[#allocation6 + $0x378] sm:$0xff]  ;;  %v140_v24 = vld [vmem:[#allocation6 + $0x270] sm:$0xff]  ;;  %v187_v27 = vld [vmem:[#allocation6 + $0x3e8] sm:$0xff] }
  0x39   :  { %720 = vmatpush3.msra.mxu1 %v98_v52  ;;  %686 = vmatprep.subr.mxu0 %v81_v53  ;;  %v172_v25 = vld [vmem:[#allocation6 + $0x370] sm:$0xff]  ;;  %v139_v28 = vld [vmem:[#allocation6 + $0x268] sm:$0xff]  ;;  %v154_v30 = vld [vmem:[#allocation6 + $0x2e0] sm:$0xff] }
  0x3a   :  { %721 = vmatprep.subr.mxu1 %v113_v54  ;;  %687 = vmatpush3.msra.mxu0 %v65_v56  ;;  %v171_v29 = vld [vmem:[#allocation6 + $0x368] sm:$0xff]  ;;  %v186_v31 = vld [vmem:[#allocation6 + $0x3e0] sm:$0xff]  ;;  %v153_v35 = vld [vmem:[#allocation6 + $0x2d8] sm:$0xff] }
  0x3b   :  { %722 = vmatpush3.msra.mxu1 %v97_v59  ;;  %688 = vmatprep.subr.mxu0 %v80_v62  ;;  %v138_v33 = vld [vmem:[#allocation6 + $0x260] sm:$0xff]  ;;  %v185_v36 = vld [vmem:[#allocation6 + $0x3d8] sm:$0xff]  ;;  %v152_v39 = vld [vmem:[#allocation6 + $0x2d0] sm:$0xff] }
  0x3c   :  { %723 = vmatprep.subr.mxu1 %v112_v63  ;;  %689 = vmatpush3.msra.mxu0 %v64_v2  ;;  %v170_v34 = vld [vmem:[#allocation6 + $0x360] sm:$0xff]  ;;  %v137_v37 = vld [vmem:[#allocation6 + $0x258] sm:$0xff]  ;;  %v184_v40 = vld [vmem:[#allocation6 + $0x3d0] sm:$0xff] }
  0x3d   :  { %724 = vmatpush3.msra.mxu1 %v96_v3  ;;  %690 = vmatprep.subr.mxu0 %v79_v6  ;;  %v169_v38 = vld [vmem:[#allocation6 + $0x358] sm:$0xff]  ;;  %v136_v41 = vld [vmem:[#allocation6 + $0x250] sm:$0xff]  ;;  %v151_v43 = vld [vmem:[#allocation6 + $0x2c8] sm:$0xff] }
  0x3e   :  { %725 = vmatprep.subr.mxu1 %v111_v7  ;;  %691 = vmatpush3.msra.mxu0 %v63_v8  ;;  %v168_v42 = vld [vmem:[#allocation6 + $0x350] sm:$0xff]  ;;  %v183_v44 = vld [vmem:[#allocation6 + $0x3c8] sm:$0xff]  ;;  %v150_v47 = vld [vmem:[#allocation6 + $0x2c0] sm:$0xff] }
  0x3f   :  { %726 = vmatpush3.msra.mxu1 %v95_v9  ;;  %692 = vmatprep.subr.mxu0 %v78_v10  ;;  %v135_v45 = vld [vmem:[#allocation6 + $0x248] sm:$0xff]  ;;  %v182_v48 = vld [vmem:[#allocation6 + $0x3c0] sm:$0xff]  ;;  %v149_v51 = vld [vmem:[#allocation6 + $0x2b8] sm:$0xff] }
  0x40   :  { %727 = vmatprep.subr.mxu1 %v110_v11  ;;  %693 = vmatpush3.msra.mxu0 %v62_v13  ;;  %v167_v46 = vld [vmem:[#allocation6 + $0x348] sm:$0xff]  ;;  %v134_v49 = vld [vmem:[#allocation6 + $0x240] sm:$0xff]  ;;  %v181_v52 = vld [vmem:[#allocation6 + $0x3b8] sm:$0xff] }
  0x41   :  { %342 = vmatprep.mubr.f32.mxu0 %v231_v12  ;;  %728 = vmatpush3.msra.mxu1 %v94_v15  ;;  %v166_v50 = vld [vmem:[#allocation6 + $0x340] sm:$0xff]  ;;  %v133_v53 = vld [vmem:[#allocation6 + $0x238] sm:$0xff]  ;;  %v148_v56 = vld [vmem:[#allocation6 + $0x2b0] sm:$0xff] }
  0x42   :  { %412 = vmatprep.mubr.f32.mxu1 %v233_v14  ;;  %343 = vmatmul.mubr.f32.vlgmr.msra.gmra.mxu0 %v230_v16  ;;  %v165_v54 = vld [vmem:[#allocation6 + $0x338] sm:$0xff]  ;;  %v180_v57 = vld [vmem:[#allocation6 + $0x3b0] sm:$0xff]  ;;  %v147_v60 = vld [vmem:[#allocation6 + $0x2a8] sm:$0xff] }
  0x43   :  { %413 = vmatmul.mubr.f32.vlgmr.msra.gmra.mxu1 %v232_v17  ;;  %732 = vmatprep.subr.mxu0 %v157_v18  ;;  %v132_v58 = vld [vmem:[#allocation6 + $0x230] sm:$0xff]  ;;  %v179_v61 = vld [vmem:[#allocation6 + $0x3a8] sm:$0xff]  ;;  %v146_v0 = vld [vmem:[#allocation6 + $0x2a0] sm:$0xff] }
  0x44   :  { %767 = vmatprep.subr.mxu1 %v189_v19  ;;  %733 = vmatpush3.msra.mxu0 %v141_v20  ;;  %v164_v59 = vld [vmem:[#allocation6 + $0x330] sm:$0xff]  ;;  %v131_v62 = vld [vmem:[#allocation6 + $0x228] sm:$0xff]  ;;  %v178_v1 = vld [vmem:[#allocation6 + $0x3a0] sm:$0xff] }
  0x45   :  { %768 = vmatpush3.msra.mxu1 %v173_v21  ;;  %734 = vmatprep.subr.mxu0 %v156_v22  ;;  %v163_v63 = vld [vmem:[#allocation6 + $0x328] sm:$0xff]  ;;  %v130_v2 = vld [vmem:[#allocation6 + $0x220] sm:$0xff]  ;;  %v145_v8 = vld [vmem:[#allocation6 + $0x298] sm:$0xff] }
  0x46   :  { %769 = vmatprep.subr.mxu1 %v188_v23  ;;  %735 = vmatpush3.msra.mxu0 %v140_v24  ;;  %v822_v3 = vld [vmem:[#allocation3 + $0x8] ss:$16 sps:$4 sm:$0xff]   ;;  %v162_v5 = vld [vmem:[#allocation6 + $0x320] sm:$0xff]  ;;  %v826_v6 = vld [vmem:[#allocation3 + $0xc] ss:$16 sps:$4 sm:$0xff]  }
  0x47   :  { %770 = vmatpush3.msra.mxu1 %v172_v25  ;;  %736 = vmatprep.subr.mxu0 %v155_v26  ;;  %v824_v4 = vld [vmem:[#allocation3 + $0x28] ss:$16 sps:$4 sm:$0xff]   ;;  %v827_v7 = vld [vmem:[#allocation3 + $0x2c] ss:$16 sps:$4 sm:$0xff]   ;;  %v144_v12 = vld [vmem:[#allocation6 + $0x290] sm:$0xff]  ;;  %v244_v14 = vrot.slane %v822_v3, %v947_v55  ;;  %v251_v18 = vrot.slane %v826_v6, %v947_v55 }
  0x48   :  { %771 = vmatprep.subr.mxu1 %v187_v27  ;;  %737 = vmatpush3.msra.mxu0 %v139_v28  ;;  %v177_v9 = vld [vmem:[#allocation6 + $0x398] sm:$0xff]  ;;  %v176_v13 = vld [vmem:[#allocation6 + $0x390] sm:$0xff]  ;;  %v258_v15 = vrot.slane %v824_v4, %v947_v55  ;;  %v265_v19 = vrot.slane %v827_v7, %v947_v55  ;;  %v143_v20 = vld [vmem:[#allocation6 + $0x288] sm:$0xff] }
  0x49   :  { %772 = vmatpush3.msra.mxu1 %v171_v29  ;;  %738 = vmatprep.subr.mxu0 %v154_v30  ;;  %v129_v10 = vld [vmem:[#allocation6 + $0x218] sm:$0xff]  ;;  %v128_v16 = vld [vmem:[#allocation6 + $0x210] sm:$0xff]  ;;  %v175_v21 = vld [vmem:[#allocation6 + $0x388] sm:$0xff] }
  0x4a   :  { %773 = vmatprep.subr.mxu1 %v186_v31  ;;  %739 = vmatpush3.msra.mxu0 %v138_v33  ;;  %v161_v11 = vld [vmem:[#allocation6 + $0x318] sm:$0xff]  ;;  %v160_v17 = vld [vmem:[#allocation6 + $0x310] sm:$0xff]  ;;  %v127_v22 = vld [vmem:[#allocation6 + $0x208] sm:$0xff]  ;;  %v267_v26 = vcombine.high %v244_v14, %v258_v15  ;;  %v269_v28 = vcombine.high %v251_v18, %v265_v19  ;;  %v266_v29 = vcombine.low %v244_v14, %v258_v15 }
  0x4b   :  { %774 = vmatpush3.msra.mxu1 %v170_v34  ;;  %740 = vmatprep.subr.mxu0 %v153_v35  ;;  %v159_v23 = vld [vmem:[#allocation6 + $0x308] sm:$0xff]  ;;  %v142_v24 = vld [vmem:[#allocation6 + $0x280] sm:$0xff]  ;;  %v268_v30 = vcombine.low %v251_v18, %v265_v19 }
  0x4c   :  { %775 = vmatprep.subr.mxu1 %v185_v36  ;;  %741 = vmatpush3.msra.mxu0 %v137_v37  ;;  %v174_v25 = vld [vmem:[#allocation6 + $0x380] sm:$0xff] }
  0x4d   :  { %776 = vmatpush3.msra.mxu1 %v169_v38  ;;  %742 = vmatprep.subr.mxu0 %v152_v39  ;;  %v126_v27 = vld [vmem:[#allocation6 + $0x200] sm:$0xff] }
  0x4e   :  { %777 = vmatprep.subr.mxu1 %v184_v40  ;;  %743 = vmatpush3.msra.mxu0 %v136_v41  ;;  %v158_v55 = vld [vmem:[#allocation6 + $0x300] sm:$0xff] }
  0x4f   :  { %778 = vmatpush3.msra.mxu1 %v168_v42  ;;  %744 = vmatprep.subr.mxu0 %v151_v43 }
  0x50   :  { %779 = vmatprep.subr.mxu1 %v183_v44  ;;  %745 = vmatpush3.msra.mxu0 %v135_v45  ;;  %v574_v44 = vand.u32 127, %v205_v32 }
  0x51   :  { %780 = vmatpush3.msra.mxu1 %v167_v46  ;;  %746 = vmatprep.subr.mxu0 %v150_v47  ;;  %v660_v47 = vld [vmem:[%s972_s2] ss:$0 sm:$0xff] }
  0x52   :  { %781 = vmatprep.subr.mxu1 %v182_v48  ;;  %747 = vmatpush3.msra.mxu0 %v134_v49  ;;  %vm575_vm0 = vcmp.lt.s32.totalorder %v574_v44, 7 }
  0x53   :  { %782 = vmatpush3.msra.mxu1 %v166_v50  ;;  %748 = vmatprep.subr.mxu0 %v149_v51  ;;  %v588_v51 = vld [vmem:[%s973_s3] sm:$0xff] }
  0x54   :  { %783 = vmatprep.subr.mxu1 %v181_v52  ;;  %749 = vmatpush3.msra.mxu0 %v133_v53  ;;  %v905_v52 = vmov 0  }
  0x55   :  { %784 = vmatpush3.msra.mxu1 %v165_v54  ;;  %750 = vmatprep.subr.mxu0 %v148_v56 }
  0x56   :  { %785 = vmatprep.subr.mxu1 %v180_v57  ;;  %751 = vmatpush3.msra.mxu0 %v132_v58 }
  0x57   :  { %786 = vmatpush3.msra.mxu1 %v164_v59  ;;  %752 = vmatprep.subr.mxu0 %v147_v60 }
  0x58   :  { %787 = vmatprep.subr.mxu1 %v179_v61  ;;  %753 = vmatpush3.msra.mxu0 %v131_v62  ;;  %v906_v62 = vmov 0.0  }
  0x59   :  { %788 = vmatpush3.msra.mxu1 %v163_v63  ;;  %754 = vmatprep.subr.mxu0 %v146_v0 }
  0x5a   :  { %789 = vmatprep.subr.mxu1 %v178_v1  ;;  %755 = vmatpush3.msra.mxu0 %v130_v2 }
  0x5b   :  { %790 = vmatpush3.msra.mxu1 %v162_v5  ;;  %756 = vmatprep.subr.mxu0 %v145_v8 }
  0x5c   :  { %791 = vmatprep.subr.mxu1 %v177_v9  ;;  %757 = vmatpush3.msra.mxu0 %v129_v10 }
  0x5d   :  { %792 = vmatpush3.msra.mxu1 %v161_v11  ;;  %758 = vmatprep.subr.mxu0 %v144_v12 }
  0x5e   :  { %793 = vmatprep.subr.mxu1 %v176_v13  ;;  %759 = vmatpush3.msra.mxu0 %v128_v16 }
  0x5f   :  { %794 = vmatpush3.msra.mxu1 %v160_v17  ;;  %760 = vmatprep.subr.mxu0 %v143_v20 }
  0x60   :  { %795 = vmatprep.subr.mxu1 %v175_v21  ;;  %761 = vmatpush3.msra.mxu0 %v127_v22 }
  0x61   :  { %796 = vmatpush3.msra.mxu1 %v159_v23  ;;  %762 = vmatprep.subr.mxu0 %v142_v24 }
  0x62   :  { %797 = vmatprep.subr.mxu1 %v174_v25  ;;  %763 = vmatpush3.msra.mxu0 %v126_v27 }
  0x63   :  { %482 = vmatprep.mubr.f32.mxu0 %v267_v26  ;;  %798 = vmatpush3.msra.mxu1 %v158_v55 }
  0x64   :  { %552 = vmatprep.mubr.f32.mxu1 %v269_v28  ;;  %483 = vmatmul.mubr.f32.vlgmr.msra.gmra.mxu0 %v266_v29 }
  0x65   :  { %553 = vmatmul.mubr.f32.vlgmr.msra.gmra.mxu1 %v268_v30  ;;  %814 = vset.pattern.permute.xlu1 %v905_v52 }
  0x66   :  { %815 = vset.pattern.permute.xlu0 %v905_v52  ;;  %590 = vperm.xlu1 %814, %v588_v51  }
  0xe1   :  { %v591_v58 = vpop.permute.xlu1 %590 }
  0xe2   :  { %vm592_vm1 = vcmp.eq.s32.totalorder %v574_v44, %v591_v58 }
  0xe3   :  { %v661_v63 = vsel %vm592_vm1, 1.0, %v906_v62 }
 0x102   :  { %v694_v31 = vpop.f32.mrf.mxu0 }
 0x103   :  { %v729_v33 = vpop.f32.mrf.mxu1 }
 0x104   :  { %v695_v34 = vpop.f32.mrf.mxu0 }
 0x105   :  { %v730_v35 = vpop.f32.mrf.mxu1  ;;  %v696_v36 = vadd.f32 %v695_v34, %v694_v31 }
 0x106   :  { %v731_v37 = vadd.f32 %v730_v35, %v729_v33 }
 0x108   :  { %v415_v42 = vadd.f32 %v731_v37, %v696_v36 }
 0x124   :  { %v764_v38 = vpop.f32.mrf.mxu0 }
 0x125   :  { %v799_v39 = vpop.f32.mrf.mxu1 }
 0x126   :  { %v765_v40 = vpop.f32.mrf.mxu0 }
 0x127   :  { %v800_v41 = vpop.f32.mrf.mxu1  ;;  %v766_v43 = vadd.f32 %v765_v40, %v764_v38 }
 0x128   :  { %v801_v46 = vadd.f32 %v800_v41, %v799_v39 }
 0x129   :  { %v485_v45 = vadd.f32 %v766_v43, %v415_v42 }
 0x12b   :  { %v555_v48 = vadd.f32 %v801_v46, %v485_v45 }
 0x12d   :  { %v571_v49 = vadd.f32 %v660_v47, %v555_v48 }
 0x12f   :  { %v576_v50 = vsel %vm575_vm0, %v571_v49, -1e+30  ;;  %572 = vst [vmem:[#allocation8] sm:$0xff] %v571_v49 }
 0x130   :  { %577 = vmax.xlane.f32.xlu0 %v576_v50 }
 0x1b9   :  { %v578_v32 = vpop.xlane.xlu0 %577 }
 0x1ba   :  { %v579_v53 = vsub.f32 %v576_v50, %v578_v32 }
 0x1bc   :  { %v580_v54 = vmul.f32 1.442695, %v579_v53 }
 0x1be   :  { %828 = vpow2.f32 %v580_v54 }
 0x1cb   :  { %v829_v56 = vpop.eup %828 }
 0x1cc   :  { %582 = vadd.xlane.f32.xlu0 %v829_v56 }
 0x255   :  { %v583_v57 = vpop.xlane.xlu0 %582 }
 0x256   :  { %830 = vlog2.f32 %v583_v57 }
 0x263   :  { %v831_v59 = vpop.eup %830 }
 0x264   :  { %v585_v60 = vmul.f32 0.6931472, %v831_v59 }
 0x266   :  { %v586_v61 = vadd.f32 %v585_v60, %v578_v32 }
 0x268   :  { %v587_v0 = vsub.f32 %v576_v50, %v586_v61 }
 0x26a   :  { %v595_v1 = vmul.f32 %v661_v63, %v587_v0 }
 0x26c   :  { %596 = vadd.xlane.f32.xlu1 %v595_v1 }
 0x2f5   :  { %v597_v2 = vpop.xlane.xlu1 %596 }
 0x2f6   :  { %v598_v3 = vsub.f32 0.0, %v597_v2 }
 0x2f8   :  { %600 = vst.msk [vmem:[#allocation9] sm:$0xff] %vm599_vm2, %v598_v3 }
 0x2f9   :  { %605 = vsyncadd [#allocation5], 96  ;;  %s907_s2 = smov [#allocation8]  }
 0x2fa   :  { %s606_s3 = sshll.u32 %s907_s2, 4  ;;  %s607_s3 = int_to_ptr.vmem [resolvable:$true] %s606_s3 }
 0x2fb   :  { %s872_s12 = scalar_lea.vmem %s607_s3, 32  ;;  %s876_s13 = scalar_lea.vmem %s607_s3, 128 }
 0x2fc   :  { %p873_p10 = scmp.ne.s32.totalorder %s607_s3, %s872_s12  ;;  %p877_p11 = scmp.lt.s32.totalorder %s607_s3, %s607_s3 }
 0x2fd   :  { %p878_p12 = scmp.lt.s32.totalorder %s876_s13, %s872_s12 }
 0x2ff   :  { %v631_v4 = vld [vmem:[#allocation9] sm:$0x3]  ;;  %p879_p13 = por %p878_p12, %p877_p11 }
 0x300   :  { %632 = vst [vmem:[%s975_s5] sm:$0x3] %v631_v4 }
 0x301   :  { %p880_p0 = pnand %p879_p13, %p873_p10 }
 0x303   :  { %883 = shalt.err (!%p880_p0)
}
 0x304   :  { %s908_s14 = smov 32   ;;  %s909_s15 = smov 2  }
 0x305   :  { %612 = dma.vmem_to_hbm [thread:$0]  %s607_s3, 32, %s974_s4, [#allocation5], %s908_s14, %s908_s14, %s909_s15  }
 0x306   :  { %896 = dma.done.wait [#allocation5], 128  }
 0x307   :  { %897 = vsyncadd [#allocation5], 4294967168 }
 0x308   :  { %653 = vsyncpa [#allocation4], 1 }
 0x309   :  { %654 = vsyncpa [#allocation7], 1 }
 0x30a   :  { %655 = vsyncpa [#allocation5], 1 }

</bundles_post_ra>
